<compile_context>
chip_gen: v5e
topology: v5e:2x2
jax: 0.10.0
libtpu: 0.0.40
codegen_flags: <defaults>
</compile_context>

<pallas_src>
import functools

import jax
import jax.numpy as jnp
from jax.experimental import pallas as pl
from jax.experimental.pallas import tpu as pltpu


def _memory_concat_kernel(mem_ref, x_ref, cat_ref, *, md, batch):
    # mem_ref: (1, M*D)       flattened memory buffer (may be a wider dtype)
    # x_ref:   (B, S*D)       flattened input, same dtype as the output
    # cat_ref: (B, (M+S)*D)   flattened concatenated output
    mem = mem_ref[...].astype(cat_ref.dtype)                  # (1, md), hoisted cast
    cat_ref[:, :md] = jnp.broadcast_to(mem, (batch, md))      # memory segment
    cat_ref[:, md:] = x_ref[...]                              # x segment (no temp, no concat)


def memory_module_forward(x, memory):
    """x: (B, S, D); memory: (1, M, D).

    Returns (x_cat (B, M+S, D) in x.dtype, memory_b (B, M, D) in memory.dtype).
    """
    B, S, D = x.shape
    mb, M, Dm = memory.shape
    assert mb == 1 and Dm == D, "memory must be (1, memory_slots, dim)"

    out_dtype = x.dtype          # do NOT promote the big output to memory.dtype
    md = M * D
    sd = S * D

    # Lane-dense 2D views (row-major reshape outside the kernel is free).
    mem_flat = memory.reshape(1, md)
    x_flat = x.reshape(B, sd)

    kernel = functools.partial(_memory_concat_kernel, md=md, batch=B)

    cat_flat = pl.pallas_call(
        kernel,
        out_shape=jax.ShapeDtypeStruct((B, md + sd), out_dtype),
        # No grid, no index_maps: whole (tiny) arrays live in VMEM for the
        # single invocation — minimal Mosaic bookkeeping.
        in_specs=[
            pl.BlockSpec(memory_space=pltpu.MemorySpace.VMEM),
            pl.BlockSpec(memory_space=pltpu.MemorySpace.VMEM),
        ],
        out_specs=pl.BlockSpec(memory_space=pltpu.MemorySpace.VMEM),
    )(mem_flat, x_flat)

    x_cat = cat_flat.reshape(B, M + S, D)

    # PyTorch's memory.expand(batch, -1, -1) is a zero-copy view in memory's
    # own dtype; mirror it lazily (no kernel writes, no dtype change).
    memory_b = jnp.broadcast_to(memory, (B, M, D))
    return x_cat, memory_b


if __name__ == "__main__":
    # Small shapes consistent with the module: batch=2, seq=8, dim=32, memory_slots=10.
    B, S, D = 2, 8, 32
    MEMORY_SLOTS = 10

    key = jax.random.PRNGKey(0)
    kx, km = jax.random.split(key)
    x = jax.random.normal(kx, (B, S, D), dtype=jnp.float32)
    # Buffer is zeros at init but arbitrary after update_memory(); use nonzero
    # values so the broadcast/concat path is actually exercised by the check.
    memory = jax.random.normal(km, (1, MEMORY_SLOTS, D), dtype=jnp.float32)

    x_cat, memory_b = memory_module_forward(x, memory)
    jax.block_until_ready((x_cat, memory_b))

    # Reference check in plain JAX (same semantics as the PyTorch forward).
    memory_ref = jnp.broadcast_to(memory, (B, MEMORY_SLOTS, D))
    x_cat_ref = jnp.concatenate([memory_ref, x], axis=1)

    assert x_cat.shape == (B, MEMORY_SLOTS + S, D)
    assert x_cat.dtype == x.dtype
    assert memory_b.shape == (B, MEMORY_SLOTS, D)
    assert memory_b.dtype == memory.dtype
    assert jnp.allclose(x_cat, x_cat_ref)
    assert jnp.allclose(memory_b, memory_ref)

    # Also confirm the zero-initialized-buffer case used at module init.
    zero_mem = jnp.zeros((1, MEMORY_SLOTS, D), dtype=jnp.float32)
    x_cat0, memory_b0 = memory_module_forward(x, zero_mem)
    jax.block_until_ready((x_cat0, memory_b0))
    assert jnp.allclose(x_cat0[:, MEMORY_SLOTS:], x)
    assert jnp.allclose(x_cat0[:, :MEMORY_SLOTS], 0.0)
    assert jnp.allclose(memory_b0, 0.0)

    print("KERNEL_OK")
</pallas_src>

<mosaic_0001>
module attributes {stable_mosaic.version = 11 : i64} {
  func.func @_memory_concat_kernel(%arg0: memref<1x320xf32, #tpu.memory_space<vmem>>, %arg1: memref<2x256xf32, #tpu.memory_space<vmem>>, %arg2: memref<2x576xf32, #tpu.memory_space<vmem>>) attributes {dimension_semantics = [], scalar_prefetch = 0 : i64, scratch_operands = 0 : i64, tpu.core_type = #tpu.core_type<tc>} {
    %c0 = arith.constant 0 : index
    %c0_0 = arith.constant 0 : index
    %0 = vector.load %arg0[%c0, %c0_0] : memref<1x320xf32, #tpu.memory_space<vmem>>, vector<1x320xf32>
    %1 = vector.shape_cast %0 : vector<1x320xf32> to vector<1x320xf32>
    %2 = vector.broadcast %1 : vector<1x320xf32> to vector<2x320xf32>
    %c0_1 = arith.constant 0 : index
    %c0_2 = arith.constant 0 : index
    %3 = vector.load %arg2[%c0_1, %c0_2] : memref<2x576xf32, #tpu.memory_space<vmem>>, vector<2x320xf32>
    tpu.vector_store %arg2[%c0_1, %c0_2], %2 {strides = array<i32>} : memref<2x576xf32, #tpu.memory_space<vmem>>, vector<2x320xf32>,
    %c0_3 = arith.constant 0 : index
    %c0_4 = arith.constant 0 : index
    %4 = vector.load %arg1[%c0_3, %c0_4] : memref<2x256xf32, #tpu.memory_space<vmem>>, vector<2x256xf32>
    %c0_5 = arith.constant 0 : index
    %c320 = arith.constant 320 : index
    %5 = vector.load %arg2[%c0_5, %c320] : memref<2x576xf32, #tpu.memory_space<vmem>>, vector<2x256xf32>
    tpu.vector_store %arg2[%c0_5, %c320], %4 {strides = array<i32>} : memref<2x576xf32, #tpu.memory_space<vmem>>, vector<2x256xf32>,
    return
  }
}

</mosaic_0001>

<bundles_post_ra>
// kernel: tpu_custom_call.1
= control target key start
LH: loop header
LB: loop body
LE: loop exit
PB: predicated region body
PF: predicated region fallthrough
CT: control target
= control target key end

     0   :  { %7 = vsyncpa [#allocation3], 0  ;;  %s197_s0 = inlined_call_operand.hbm [shape: f32[1,320], index: 0, kind: input, shape index: {}]   ;;  %s198_s1 = inlined_call_operand.hbm [shape: f32[2,256], index: 1, kind: input, shape index: {}]   ;;  %s199_s2 = inlined_call_operand.hbm [shape: f32[2,576], index: 2, kind: output, shape index: {}]  }
   0x1   :  { %8 = vsyncpa [#allocation6], 0 }
   0x2   :  { %9 = vsyncpa [#allocation4], 0  ;;  %s15_s11 = sshll.u32 %s197_s0, 4  ;;  %s169_s12 = smov [#allocation2]   ;;  %s16_s11 = int_to_ptr.hbm [resolvable:$true] %s15_s11 }
   0x3   :  { %s17_s13 = sshll.u32 %s169_s12, 4  ;;  %s26_s16 = sshll.u32 %s198_s1, 4  ;;  %s18_s13 = int_to_ptr.vmem [resolvable:$true] %s17_s13  ;;  %s27_s16 = int_to_ptr.hbm [resolvable:$true] %s26_s16 }
   0x4   :  { %20 = dma.hbm_to_vmem [thread:$0]  %s16_s11, 48, %s18_s13, [#allocation3]  }
   0x5   :  { %s170_s17 = smov [#allocation5]  }
   0x6   :  { %s28_s18 = sshll.u32 %s170_s17, 4  ;;  %s29_s18 = int_to_ptr.vmem [resolvable:$true] %s28_s18 }
   0x7   :  { %31 = dma.hbm_to_vmem [thread:$0]  %s27_s16, 64, %s29_s18, [#allocation6]  }
   0x8   :  { %163 = dma.done.wait [#allocation3], 48  }
   0x9   :  { %164 = vsyncadd [#allocation3], 4294967248 }
   0xa   :  { %165 = dma.done.wait [#allocation6], 64  }
   0xb   :  { %166 = vsyncadd [#allocation6], 4294967232  ;;  %v57_v0 = vld [vmem:[#allocation5] sm:$0xf]  ;;  %s171_s0 = smov 64   ;;  %vm47_vm0 = vcmask 1041408  }
   0xc   :  { %59 = vrot.lane.b32.xlu0 %v57_v0, %s171_s0  ;;  %v40_v1 = vld [vmem:[#allocation2] sm:$0x7]  ;;  %vm52_vm1 = vcmask 1043458   ;;  %vm49_vm2 = vcmask 1043456   ;;  %vm54_vm4 = vcmask 521220   ;;  %vm65_vm6 = vcmask 1041920  }
   0xd   :  { %v43_v2 = vperm.slane %v40_v1, 1  ;;  %v44_v3 = vperm.slane %v40_v1, 2  ;;  %v42_v4 = vperm.slane %v40_v1, 0  ;;  %vm53_vm3 = vmor %vm52_vm1, %vm47_vm0  ;;  %s172_s1 = smov [#allocation7]   ;;  %s76_s22 = sshll.u32 %s199_s2, 4  ;;  %vm62_vm8 = vcmask 523264   ;;  %s77_s22 = int_to_ptr.hbm [resolvable:$true] %s76_s22 }
   0xe   :  { %vm55_vm5 = vmor %vm54_vm4, %vm53_vm3  ;;  %s74_s19 = sshll.u32 %s172_s1, 4  ;;  %s75_s19 = int_to_ptr.vmem [resolvable:$true] %s74_s19 }
   0xf   :  { %v45_v5 = vrot.slane %v43_v2, 6  ;;  %v46_v6 = vrot.slane %v44_v3, 4  ;;  %vm66_vm7 = vmor %vm52_vm1, %vm65_vm6 }
  0x10   :  { %vm67_vm9 = vmor %vm54_vm4, %vm66_vm7 }
  0x11   :  { %v48_v7 = vsel %vm47_vm0, %v42_v4, %v45_v5 }
  0x12   :  { %v50_v8 = vsel %vm49_vm2, %v48_v7, %v46_v6 }
  0x13   :  { %56 = vst.msk [vmem:[#allocation7] sm:$0x3f] %vm55_vm5, %v50_v8 }
  0x7e   :  { %v60_v9 = vpop.permute.xlu0 %59 }
  0x7f   :  { %v61_v10 = vrot.slane %v60_v9, 6 }
  0x81   :  { %v63_v11 = vsel %vm62_vm8, %v61_v10, %v60_v9 }
  0x82   :  { %68 = vst.msk [vmem:[#allocation7 + $0x4] sm:$0x3f] %vm67_vm9, %v63_v11 }
  0x83   :  { %79 = dma.vmem_to_hbm [thread:$0]  %s75_s19, 160, %s77_s22, [#allocation4]  }
  0x84   :  { %167 = dma.done.wait [#allocation4], 160  }
  0x85   :  { %168 = vsyncadd [#allocation4], 4294967136 }
  0x86   :  { %84 = vsyncpa [#allocation3], 1 }
  0x87   :  { %85 = vsyncpa [#allocation6], 1 }
  0x88   :  { %86 = vsyncpa [#allocation4], 1 }

</bundles_post_ra>
